<compile_context>
chip_gen: v6e
topology: v6e:2x2x1
jax: 0.10.0
libtpu: 0.0.40
codegen_flags: <defaults>
</compile_context>

<pallas_src>
import functools

import numpy as np
import jax
import jax.numpy as jnp
from jax import lax
from jax.experimental import pallas as pl
from jax.experimental.pallas import tpu as pltpu


def _conv3x3_rowmm_kernel(x_ref, w_ref, b_ref, o_ref, *, H, W, Cin, Cout, Bt):
    """One grid step = Bt images of the flattened (b*n) batch.

    x_ref : (Bt, H, W*Cin)      channels-last rows, lane dim = (x, ci)
    w_ref : (3, W*Cin, W*Cout)  banded per-kernel-row weight matrices
    b_ref : (1, W*Cout)         bias tiled along x (lane dim = (x, co))
    o_ref : (Bt, H, W*Cout)     lane-dense output (last dim = 128 for demo shapes)
    """
    K = W * Cin
    N = W * Cout
    M = Bt * H

    # (Bt, H, K) -> (M, K): merges leading dims only (H % 8 == 0), layout preserving.
    x = x_ref[...].reshape(M, K)

    # Row index within each image (images are contiguous blocks of H rows).
    rows = lax.broadcasted_iota(jnp.int32, (M, K), 0)
    r_in = rows % H

    # Neighbouring rows with zero fill at image boundaries ('padding=1' in y).
    # pltpu.roll is cyclic and requires a non-negative shift:
    #   shift=1     -> out[r] = x[r-1]
    #   shift=M-1   -> out[r] = x[r+1]   (== shift=-1 modulo M)
    # The wrapped-around garbage rows land exactly on the masked boundary rows.
    x_dn = jnp.where(r_in == 0, 0.0, pltpu.roll(x, shift=1, axis=0))         # x[r-1]
    x_up = jnp.where(r_in == H - 1, 0.0, pltpu.roll(x, shift=M - 1, axis=0)) # x[r+1]
    x_dn = x_dn.astype(x.dtype)
    x_up = x_up.astype(x.dtype)

    # out[y] = x[y-1] @ Wrow0 + x[y] @ Wrow1 + x[y+1] @ Wrow2   (f32 accumulation)
    acc = jnp.dot(x_dn, w_ref[0], preferred_element_type=jnp.float32)
    acc += jnp.dot(x, w_ref[1], preferred_element_type=jnp.float32)
    acc += jnp.dot(x_up, w_ref[2], preferred_element_type=jnp.float32)

    acc = jnp.maximum(acc + b_ref[...], 0.0)                  # bias + ReLU
    o_ref[...] = acc.reshape(Bt, H, N).astype(o_ref.dtype)


def _build_row_weights(w_oihw, W):
    """Fold the 3x3 conv weight (OIHW) into 3 banded (W*Cin, W*Cout) matrices.

    Wrow[ky][x'*Cin + ci, x*Cout + co] = w[co, ci, ky, x - x' + 1]  (0 elsewhere).
    The zero band edges implement the x-direction 'padding=1' for free.
    NOTE: this W-folded formulation targets small W*C (lane-dense at W*Cout>=128);
    for large channel counts one would pad channels to 128 lanes instead.
    """
    Cout, Cin, KH, KW = w_oihw.shape
    w_hwio = jnp.transpose(w_oihw, (2, 3, 1, 0))              # (KH, KW, Cin, Cout)
    sel = np.zeros((KW, W, W), np.float32)                    # sel[kx, x', x]
    for kx in range(KW):
        for x in range(W):
            xs = x + kx - (KW // 2)
            if 0 <= xs < W:
                sel[kx, xs, x] = 1.0
    sel = jnp.asarray(sel, dtype=w_hwio.dtype)
    # (ky, x', ci, x, co) -> (ky, W*Cin, W*Cout)
    wrow = jnp.einsum("kpx,gkio->gpixo", sel, w_hwio)
    return wrow.reshape(KH, W * Cin, W * Cout)


def _choose_block_batch(B, per_image_bytes, vmem_budget_bytes=4 << 20):
    """How many images to fuse per grid step: big tiles, but keep >=2 grid steps."""
    bt = max(1, min(B, vmem_budget_bytes // max(per_image_bytes, 1)))
    while B % bt:
        bt -= 1
    if bt == B and B % 2 == 0:
        bt = B // 2       # >=2 "parallel" grid steps so both v7x TCs get work
    return bt


def conv3x3_bias_relu_pallas(x_rows, w_rows, bias_row, *, H, W, Cin, Cout):
    """x_rows: (B, H, W*Cin); w_rows: (3, W*Cin, W*Cout); bias_row: (1, W*Cout).

    Returns (B, H, W*Cout) float32.
    """
    B = x_rows.shape[0]
    K = W * Cin
    N = W * Cout

    per_img = H * (K + N) * x_rows.dtype.itemsize
    Bt = _choose_block_batch(B, per_img)
    grid = (B // Bt,)

    kernel = functools.partial(_conv3x3_rowmm_kernel,
                               H=H, W=W, Cin=Cin, Cout=Cout, Bt=Bt)

    flops = 2 * 3 * (B * H) * K * N            # actual MXU work (banded matmuls)
    bytes_accessed = (x_rows.size * x_rows.dtype.itemsize
                      + w_rows.size * w_rows.dtype.itemsize
                      + bias_row.size * bias_row.dtype.itemsize
                      + B * H * N * 4)

    return pl.pallas_call(
        kernel,
        out_shape=jax.ShapeDtypeStruct((B, H, N), jnp.float32),
        grid=grid,
        in_specs=[
            pl.BlockSpec((Bt, H, K), lambda i: (i, 0, 0)),
            # Weight / bias index_maps are grid-constant -> fetched only once.
            pl.BlockSpec((3, K, N), lambda i: (0, 0, 0)),
            pl.BlockSpec((1, N), lambda i: (0, 0)),
        ],
        out_specs=pl.BlockSpec((Bt, H, N), lambda i: (i, 0, 0)),
        compiler_params=pltpu.CompilerParams(
            dimension_semantics=("parallel",)),
        cost_estimate=pl.CostEstimate(flops=flops, transcendentals=0,
                                      bytes_accessed=bytes_accessed),
    )(x_rows, w_rows, bias_row)


def en_decoder_forward(image_bnchw, w_oihw, bias, *, mxu_dtype=None):
    """Pallas equivalent of En_Decoder.forward with the synthetic conv backbone.

    image_bnchw : (b, n, C, H, W)   batch['image'], PyTorch NCHW-per-view
    w_oihw      : (Cout, Cin, 3, 3) PyTorch-layout conv weight
    bias        : (Cout,)
    returns     : (b*n, Cout, H, W) features (NCHW, like the PyTorch backbone)
    """
    b, n, C, H, W = image_bnchw.shape
    B = b * n
    Cout = w_oihw.shape[0]

    image = image_bnchw.reshape(B, C, H, W)                  # flatten(0, 1): free
    # NCHW -> (B, H, W*Cin): single layout pass kept only to honor the PyTorch
    # NCHW boundary; the conv's zero padding itself is handled inside the kernel.
    x_rows = jnp.transpose(image, (0, 2, 3, 1)).reshape(B, H, W * C)

    w_rows = _build_row_weights(w_oihw, W)                   # (3, W*Cin, W*Cout)
    bias_row = jnp.tile(bias, W).reshape(1, W * Cout)        # lane = (x, co)

    if mxu_dtype is not None:      # e.g. jnp.bfloat16 on v6e/v7x (f32 accumulation)
        x_rows = x_rows.astype(mxu_dtype)
        w_rows = w_rows.astype(mxu_dtype)

    out = conv3x3_bias_relu_pallas(x_rows, w_rows, bias_row,
                                   H=H, W=W, Cin=C, Cout=Cout)
    # (B, H, W*Cout) -> (B, Cout, H, W): boundary-layout transpose back to NCHW.
    return jnp.transpose(out.reshape(B, H, W, Cout), (0, 3, 1, 2))


if __name__ == "__main__":
    # Small shapes consistent with the forward: (b, n, C, H, W)
    b, n, C, H, W = 2, 2, 4, 16, 16
    Cout = 8      # W*Cout = 128 -> lane-dense (unmasked) output stores

    key = jax.random.PRNGKey(0)
    k_img, k_w, k_b = jax.random.split(key, 3)

    image = jax.random.normal(k_img, (b, n, C, H, W), dtype=jnp.float32)
    # Deterministic synthetic backbone parameters (PyTorch OIHW layout).
    # TODO(synk): the real En_Decoder wraps an arbitrary constructor-supplied
    # backbone (e.g. EfficientNet); only this representative conv+ReLU layer is
    # implemented as a Pallas kernel.
    w_oihw = (jax.random.normal(k_w, (Cout, C, 3, 3), dtype=jnp.float32)
              * (1.0 / (C * 9) ** 0.5))
    bias = jax.random.normal(k_b, (Cout,), dtype=jnp.float32) * 0.01

    feats = jax.jit(en_decoder_forward)(image, w_oihw, bias)
    feats = jax.block_until_ready(feats)
    assert feats.shape == (b * n, Cout, H, W), feats.shape

    # Correctness check against XLA's conv (conv3x3 SAME + bias + ReLU), NCHW output.
    x_nhwc = jnp.transpose(image.reshape(b * n, C, H, W), (0, 2, 3, 1))
    w_hwio = jnp.transpose(w_oihw, (2, 3, 1, 0))
    ref = lax.conv_general_dilated(
        x_nhwc, w_hwio, window_strides=(1, 1), padding="SAME",
        dimension_numbers=("NHWC", "HWIO", "NHWC"))
    ref = jnp.maximum(ref + bias, 0.0)
    ref = jnp.transpose(ref, (0, 3, 1, 2))
    assert jnp.allclose(feats, ref, atol=1e-4, rtol=1e-4), \
        float(jnp.max(jnp.abs(feats - ref)))

    print("KERNEL_OK")
</pallas_src>

<mosaic_0001>
module attributes {stable_mosaic.version = 11 : i64} {
  func.func @_conv3x3_rowmm_kernel(%arg0: i32, %arg1: memref<2x16x64xf32, #tpu.memory_space<vmem>>, %arg2: memref<3x64x128xf32, #tpu.memory_space<vmem>>, %arg3: memref<1x128xf32, #tpu.memory_space<vmem>>, %arg4: memref<2x16x128xf32, #tpu.memory_space<vmem>>) attributes {dimension_semantics = [#tpu.dimension_semantics<parallel>], iteration_bounds = array<i64: 2>, scalar_prefetch = 0 : i64, scratch_operands = 0 : i64, tpu.core_type = #tpu.core_type<tc>, window_params = [{transform_indices = @transform_0, window_bounds = array<i64: 2, 16, 64>}, {pipeline_mode = #tpu.pipeline_mode<synchronous>, transform_indices = @transform_1, window_bounds = array<i64: 3, 64, 128>}, {pipeline_mode = #tpu.pipeline_mode<synchronous>, transform_indices = @transform_2, window_bounds = array<i64: 1, 128>}, {transform_indices = @transform_3, window_bounds = array<i64: 2, 16, 128>}]} {
    %c0 = arith.constant 0 : index
    %c0_0 = arith.constant 0 : index
    %c0_1 = arith.constant 0 : index
    %0 = vector.load %arg1[%c0, %c0_0, %c0_1] : memref<2x16x64xf32, #tpu.memory_space<vmem>>, vector<2x16x64xf32>
    %1 = vector.shape_cast %0 : vector<2x16x64xf32> to vector<32x64xf32>
    %2 = tpu.iota {dimensions = array<i32: 0>} : vector<32x64xi32>
    %c16_i32 = arith.constant 16 : i32
    %c0_i32 = arith.constant 0 : i32
    %3 = arith.cmpi eq, %c16_i32, %c0_i32 : i32
    %c1_i32 = arith.constant 1 : i32
    %4 = arith.select %3, %c1_i32, %c16_i32 : i32
    %5 = vector.broadcast %4 : i32 to vector<32x64xi32>
    %6 = arith.remsi %2, %5 : vector<32x64xi32>
    %c0_i32_2 = arith.constant 0 : i32
    %7 = vector.broadcast %c0_i32_2 : i32 to vector<32x64xi32>
    %8 = arith.cmpi ne, %6, %7 : vector<32x64xi32>
    %c0_i32_3 = arith.constant 0 : i32
    %9 = vector.broadcast %c0_i32_3 : i32 to vector<32x64xi32>
    %10 = arith.cmpi slt, %6, %9 : vector<32x64xi32>
    %c0_i32_4 = arith.constant 0 : i32
    %11 = arith.cmpi slt, %4, %c0_i32_4 : i32
    %12 = vector.broadcast %11 : i1 to vector<32x64xi1>
    %13 = vector.broadcast %12 : vector<32x64xi1> to vector<32x64xi1>
    %14 = arith.xori %10, %13 : vector<32x64xi1>
    %15 = arith.andi %14, %8 : vector<32x64xi1>
    %16 = vector.broadcast %4 : i32 to vector<32x64xi32>
    %17 = arith.addi %6, %16 : vector<32x64xi32>
    %18 = arith.select %15, %17, %6 : vector<32x64xi1>, vector<32x64xi32>
    %c0_i32_5 = arith.constant 0 : i32
    %19 = vector.broadcast %c0_i32_5 : i32 to vector<32x64xi32>
    %20 = arith.cmpi eq, %18, %19 : vector<32x64xi32>
    %c1_i32_6 = arith.constant 1 : i32
    %21 = tpu.dynamic_rotate %1 by %c1_i32_6 dim 0 : vector<32x64xf32>, i32 -> vector<32x64xf32>
    %cst = arith.constant 0.000000e+00 : f32
    %22 = vector.broadcast %cst : f32 to vector<32x64xf32>
    %23 = arith.select %20, %22, %21 : vector<32x64xi1>, vector<32x64xf32>
    %c15_i32 = arith.constant 15 : i32
    %24 = vector.broadcast %c15_i32 : i32 to vector<32x64xi32>
    %25 = arith.cmpi eq, %18, %24 : vector<32x64xi32>
    %c31_i32 = arith.constant 31 : i32
    %26 = tpu.dynamic_rotate %1 by %c31_i32 dim 0 : vector<32x64xf32>, i32 -> vector<32x64xf32>
    %cst_7 = arith.constant 0.000000e+00 : f32
    %27 = vector.broadcast %cst_7 : f32 to vector<32x64xf32>
    %28 = arith.select %25, %27, %26 : vector<32x64xi1>, vector<32x64xf32>
    %c0_8 = arith.constant 0 : index
    %c0_9 = arith.constant 0 : index
    %c0_10 = arith.constant 0 : index
    %29 = vector.load %arg2[%c0_8, %c0_9, %c0_10] : memref<3x64x128xf32, #tpu.memory_space<vmem>>, vector<1x64x128xf32>
    %30 = vector.shape_cast %29 : vector<1x64x128xf32> to vector<64x128xf32>
    %cst_11 = arith.constant dense<0.000000e+00> : vector<32x128xf32>
    %31 = tpu.matmul %23, %30, %cst_11 {dimension_numbers = #tpu.dot_dimension_numbers<[1], [0], [0], [1], [0, 0, 1, 1], [], []>} : vector<32x64xf32>, vector<64x128xf32>, vector<32x128xf32> -> vector<32x128xf32>
    %c1 = arith.constant 1 : index
    %c0_12 = arith.constant 0 : index
    %c0_13 = arith.constant 0 : index
    %32 = vector.load %arg2[%c1, %c0_12, %c0_13] : memref<3x64x128xf32, #tpu.memory_space<vmem>>, vector<1x64x128xf32>
    %33 = vector.shape_cast %32 : vector<1x64x128xf32> to vector<64x128xf32>
    %cst_14 = arith.constant dense<0.000000e+00> : vector<32x128xf32>
    %34 = tpu.matmul %1, %33, %cst_14 {dimension_numbers = #tpu.dot_dimension_numbers<[1], [0], [0], [1], [0, 0, 1, 1], [], []>} : vector<32x64xf32>, vector<64x128xf32>, vector<32x128xf32> -> vector<32x128xf32>
    %35 = arith.addf %31, %34 : vector<32x128xf32>
    %c2 = arith.constant 2 : index
    %c0_15 = arith.constant 0 : index
    %c0_16 = arith.constant 0 : index
    %36 = vector.load %arg2[%c2, %c0_15, %c0_16] : memref<3x64x128xf32, #tpu.memory_space<vmem>>, vector<1x64x128xf32>
    %37 = vector.shape_cast %36 : vector<1x64x128xf32> to vector<64x128xf32>
    %cst_17 = arith.constant dense<0.000000e+00> : vector<32x128xf32>
    %38 = tpu.matmul %28, %37, %cst_17 {dimension_numbers = #tpu.dot_dimension_numbers<[1], [0], [0], [1], [0, 0, 1, 1], [], []>} : vector<32x64xf32>, vector<64x128xf32>, vector<32x128xf32> -> vector<32x128xf32>
    %39 = arith.addf %35, %38 : vector<32x128xf32>
    %c0_18 = arith.constant 0 : index
    %c0_19 = arith.constant 0 : index
    %40 = vector.load %arg3[%c0_18, %c0_19] : memref<1x128xf32, #tpu.memory_space<vmem>>, vector<1x128xf32>
    %41 = vector.broadcast %40 : vector<1x128xf32> to vector<32x128xf32>
    %42 = arith.addf %39, %41 : vector<32x128xf32>
    %cst_20 = arith.constant 0.000000e+00 : f32
    %43 = vector.broadcast %cst_20 : f32 to vector<32x128xf32>
    %44 = arith.maximumf %42, %43 : vector<32x128xf32>
    %45 = vector.shape_cast %44 : vector<32x128xf32> to vector<2x16x128xf32>
    %c0_21 = arith.constant 0 : index
    %c0_22 = arith.constant 0 : index
    %c0_23 = arith.constant 0 : index
    %46 = vector.load %arg4[%c0_21, %c0_22, %c0_23] : memref<2x16x128xf32, #tpu.memory_space<vmem>>, vector<2x16x128xf32>
    tpu.vector_store %arg4[%c0_21, %c0_22, %c0_23], %45 {strides = array<i32>} : memref<2x16x128xf32, #tpu.memory_space<vmem>>, vector<2x16x128xf32>,
    return
  }
  func.func @transform_0(%arg0: i32) -> (i32, i32, i32) {
    %c0_i32 = arith.constant 0 : i32
    %c0_i32_0 = arith.constant 0 : i32
    %c0_i32_1 = arith.constant 0 : i32
    return %arg0, %c0_i32, %c0_i32_0 : i32, i32, i32
  }
  func.func @transform_1(%arg0: i32) -> (i32, i32, i32) {
    %c0_i32 = arith.constant 0 : i32
    %c0_i32_0 = arith.constant 0 : i32
    %c0_i32_1 = arith.constant 0 : i32
    %c0_i32_2 = arith.constant 0 : i32
    return %c0_i32, %c0_i32_0, %c0_i32_1 : i32, i32, i32
  }
  func.func @transform_2(%arg0: i32) -> (i32, i32) {
    %c0_i32 = arith.constant 0 : i32
    %c0_i32_0 = arith.constant 0 : i32
    %c0_i32_1 = arith.constant 0 : i32
    return %c0_i32, %c0_i32_0 : i32, i32
  }
  func.func @transform_3(%arg0: i32) -> (i32, i32, i32) {
    %c0_i32 = arith.constant 0 : i32
    %c0_i32_0 = arith.constant 0 : i32
    %c0_i32_1 = arith.constant 0 : i32
    return %arg0, %c0_i32, %c0_i32_0 : i32, i32, i32
  }
}

</mosaic_0001>

<bundles_post_ra>
// kernel: tile.8
= control target key start
LH: loop header
LB: loop body
LE: loop exit
PB: predicated region body
PF: predicated region fallthrough
CT: control target
= control target key end

     0   :  { %s28_s0 = inlined_call_operand.vmem [shape: f32[8], index: 0, kind: input, shape index: {}]   ;;  %s29_s1 = inlined_call_operand.vmem [shape: f32[16,8], index: 1, kind: output, shape index: {}]  }
   0x1   :  { %v4_v0 = vld [vmem:[%s28_s0] ss:$0 sm:$0xff] }
   0x2   :  { %5 = vst [vmem:[%s29_s1] sm:$0xff] %v4_v0  ;;  %8 = vst [vmem:[%s29_s1 + $0x8] sm:$0xff] %v4_v0 }

// kernel: tile.9
= control target key start
LH: loop header
LB: loop body
LE: loop exit
PB: predicated region body
PF: predicated region fallthrough
CT: control target
= control target key end

     0   :  { %s133_s10 = smov 120   ;;  %s134_s11 = smov 104   ;;  %vm3_vm0 = vcmask 64512   ;;  %vm9_vm1 = vcmask 1048512   ;;  %vm15_vm2 = vcmask 982912   ;;  %vm21_vm3 = vcmask 917312   ;;  %s209_s0 = inlined_call_operand.vmem [shape: f32[16,8], index: 0, kind: input, shape index: {}]   ;;  %s210_s1 = inlined_call_operand.vmem [shape: f32[1,128], index: 1, kind: output, shape index: {}]  }
   0x1   :  { %v103_v0 = vld [vmem:[%s209_s0 + $0xf] sm:$0x1]   ;;  %v105_v1 = vld [vmem:[%s209_s0 + $0xd] sm:$0x1]   ;;  %v104_v2 = vld [vmem:[%s209_s0 + $0xe] sm:$0x1]  }
   0x2   :  { %7 = vrot.lane.b32.xlu0 %v103_v0, %s133_s10  ;;  %19 = vrot.lane.b32.xlu1 %v105_v1, %s134_s11  ;;  %v106_v3 = vld [vmem:[%s209_s0 + $0xc] sm:$0x1]   ;;  %s135_s16 = smov 112   ;;  %s136_s17 = smov 96   ;;  %v107_v4 = vld [vmem:[%s209_s0 + $0xb] sm:$0x1]  }
   0x3   :  { %v108_v5 = vld [vmem:[%s209_s0 + $0xa] sm:$0x1]   ;;  %v2_v6 = vld [vmem:[%s209_s0] sm:$0x1]   ;;  %s137_s24 = smov 88   ;;  %s138_s25 = smov 80  }
   0x4   :  { %4 = vst.msk [vmem:[#allocation0] sm:$0x1] %vm3_vm0, %v2_v6   ;;  %v109_v7 = vld [vmem:[%s209_s0 + $0x9] sm:$0x1]   ;;  %v110_v8 = vld [vmem:[%s209_s0 + $0x8] sm:$0x1]  }
   0x5   :  { %s139_s30 = smov 72   ;;  %s140_s2 = smov 64   ;;  %v111_v9 = vld [vmem:[%s209_s0 + $0x7] sm:$0x1]   ;;  %v112_v10 = vld [vmem:[%s209_s0 + $0x6] sm:$0x1]  }
   0x6   :  { %13 = vrot.lane.b32.xlu0 %v104_v2, %s135_s16  ;;  %25 = vrot.lane.b32.xlu1 %v106_v3, %s136_s17  ;;  %s141_s7 = smov 56   ;;  %s142_s8 = smov 48   ;;  %v113_v11 = vld [vmem:[%s209_s0 + $0x5] sm:$0x1]   ;;  %v114_v12 = vld [vmem:[%s209_s0 + $0x4] sm:$0x1]  }
   0x7   :  { %s143_s13 = smov 40   ;;  %s144_s14 = smov 32   ;;  %v115_v13 = vld [vmem:[%s209_s0 + $0x3] sm:$0x1]   ;;  %v116_v14 = vld [vmem:[%s209_s0 + $0x2] sm:$0x1]  }
   0x8   :  { %s145_s19 = smov 24   ;;  %s146_s20 = smov 16   ;;  %v117_v15 = vld [vmem:[%s209_s0 + $0x1] sm:$0x1]   ;;  %vm27_vm4 = vcmask 851712   ;;  %vm33_vm5 = vcmask 786112  }
   0x9   :  { %s147_s0 = smov 8   ;;  %vm39_vm6 = vcmask 720512   ;;  %vm45_vm7 = vcmask 654912   ;;  %vm51_vm8 = vcmask 589312   ;;  %vm57_vm9 = vcmask 523712  }
   0xa   :  { %31 = vrot.lane.b32.xlu0 %v107_v4, %s137_s24  ;;  %37 = vrot.lane.b32.xlu1 %v108_v5, %s138_s25  ;;  %vm63_vm10 = vcmask 458112   ;;  %vm69_vm11 = vcmask 392512   ;;  %vm75_vm12 = vcmask 326912   ;;  %vm81_vm13 = vcmask 261312  }
   0xb   :  { %vm87_vm14 = vcmask 195712   ;;  %vm93_vm15 = vcmask 130112  }
   0xe   :  { %43 = vrot.lane.b32.xlu0 %v109_v7, %s139_s30  ;;  %49 = vrot.lane.b32.xlu1 %v110_v8, %s140_s2 }
  0x12   :  { %55 = vrot.lane.b32.xlu0 %v111_v9, %s141_s7  ;;  %61 = vrot.lane.b32.xlu1 %v112_v10, %s142_s8 }
  0x16   :  { %67 = vrot.lane.b32.xlu0 %v113_v11, %s143_s13  ;;  %73 = vrot.lane.b32.xlu1 %v114_v12, %s144_s14 }
  0x1a   :  { %79 = vrot.lane.b32.xlu0 %v115_v13, %s145_s19  ;;  %85 = vrot.lane.b32.xlu1 %v116_v14, %s146_s20 }
  0x1e   :  { %91 = vrot.lane.b32.xlu0 %v117_v15, %s147_s0 }
  0x74   :  { %v8_v16 = vpop.permute.xlu0 %7   ;;  %v20_v17 = vpop.permute.xlu1 %19  }
  0x75   :  { %10 = vst.msk [vmem:[#allocation0] sm:$0x1] %vm9_vm1, %v8_v16  }
  0x78   :  { %v14_v18 = vpop.permute.xlu0 %13   ;;  %v26_v19 = vpop.permute.xlu1 %25  }
  0x79   :  { %16 = vst.msk [vmem:[#allocation0] sm:$0x1] %vm15_vm2, %v14_v18  }
  0x7a   :  { %22 = vst.msk [vmem:[#allocation0] sm:$0x1] %vm21_vm3, %v20_v17  }
  0x7b   :  { %28 = vst.msk [vmem:[#allocation0] sm:$0x1] %vm27_vm4, %v26_v19  }
  0x7c   :  { %v32_v20 = vpop.permute.xlu0 %31   ;;  %v38_v21 = vpop.permute.xlu1 %37  }
  0x7d   :  { %34 = vst.msk [vmem:[#allocation0] sm:$0x1] %vm33_vm5, %v32_v20  }
  0x7e   :  { %40 = vst.msk [vmem:[#allocation0] sm:$0x1] %vm39_vm6, %v38_v21  }
  0x80   :  { %v44_v22 = vpop.permute.xlu0 %43   ;;  %v50_v23 = vpop.permute.xlu1 %49  }
  0x81   :  { %46 = vst.msk [vmem:[#allocation0] sm:$0x1] %vm45_vm7, %v44_v22  }
  0x82   :  { %52 = vst.msk [vmem:[#allocation0] sm:$0x1] %vm51_vm8, %v50_v23  }
  0x84   :  { %v56_v24 = vpop.permute.xlu0 %55   ;;  %v62_v25 = vpop.permute.xlu1 %61  }
  0x85   :  { %58 = vst.msk [vmem:[#allocation0] sm:$0x1] %vm57_vm9, %v56_v24  }
  0x86   :  { %64 = vst.msk [vmem:[#allocation0] sm:$0x1] %vm63_vm10, %v62_v25  }
  0x88   :  { %v68_v26 = vpop.permute.xlu0 %67   ;;  %v74_v27 = vpop.permute.xlu1 %73  }
  0x89   :  { %70 = vst.msk [vmem:[#allocation0] sm:$0x1] %vm69_vm11, %v68_v26  }
  0x8a   :  { %76 = vst.msk [vmem:[#allocation0] sm:$0x1] %vm75_vm12, %v74_v27  }
  0x8c   :  { %v80_v28 = vpop.permute.xlu0 %79   ;;  %v86_v29 = vpop.permute.xlu1 %85  }
  0x8d   :  { %82 = vst.msk [vmem:[#allocation0] sm:$0x1] %vm81_vm13, %v80_v28  }
  0x8e   :  { %88 = vst.msk [vmem:[#allocation0] sm:$0x1] %vm87_vm14, %v86_v29  }
  0x90   :  { %v92_v30 = vpop.permute.xlu0 %91  }
  0x91   :  { %94 = vst.msk [vmem:[#allocation0] sm:$0x1] %vm93_vm15, %v92_v30  }
  0x98   :  { %v99_v31 = vld [vmem:[#allocation0] sm:$0x1] }
  0x99   :  { %102 = vst [vmem:[%s210_s1] sm:$0x1] %v99_v31 }

// kernel: en_decoder_forward.1
= control target key start
LH: loop header
LB: loop body
LE: loop exit
PB: predicated region body
PF: predicated region fallthrough
CT: control target
= control target key end

     0   :  { %s867_s12 = smov 0   ;;  %s1056_s0 = inlined_call_operand.vmem [shape: f32[4,16,64], index: 0, kind: input, shape index: {}]   ;;  %s1057_s1 = inlined_call_operand.vmem [shape: f32[3,64,128], index: 1, kind: input, shape index: {}]   ;;  %s1058_s2 = inlined_call_operand.vmem [shape: f32[1,128], index: 2, kind: input, shape index: {}]   ;;  %s1059_s3 = inlined_call_operand.vmem [shape: f32[4,16,128], index: 3, kind: output, shape index: {}]  }
   0x1 LB: > { %s669_s13 = sadd.s32 4294967295, %s845_s12   ;;  %p673_p0 = scmp.ge.s32.totalorder %s845_s12, 1  ;;  %s845_s12 = sphi %s867_s12, %s13_s12  }
   0x2   : > { %p139_p1 = scmp.lt.s32.totalorder %s845_s12, 3 }
   0x4   : > { %p140_p2 = pnand %p673_p0, %p139_p1 }
   0x5   : > { %s674_s20 = sshll.u32 (!%p140_p2), %s669_s13, 1 }
   0x6   : > { %143 = sbr.rel (%p140_p2) target bundleno = 252 (0xfc), region = 32  ;;  %p166_p3 = scmp.lt.s32.totalorder (!%p140_p2), %s674_s20, 3 }
   0xb   : > { %v687_v0 = vld [vmem:[%s1057_s1 + $0x78] sm:$0xff]  ;;  %v686_v2 = vld [vmem:[%s1057_s1 + $0x70] sm:$0xff]  ;;  %v183_v3 = vlaneseq  ;;  %v685_v5 = vld [vmem:[%s1057_s1 + $0x68] sm:$0xff]  ;;  %s1069_s20 = smov (!%p166_p3, %s674_s20), 3  ;;  %vm287_vm2 = vcmask 523264  }
   0xc   : > { %v277_v1 = vld [vmem:[%s1057_s1 + $0x38] sm:$0xff]  ;;  %749 = vmatprep.subr.mxu0 %v687_v0  ;;  %v276_v4 = vld [vmem:[%s1057_s1 + $0x30] sm:$0xff]  ;;  %v275_v6 = vld [vmem:[%s1057_s1 + $0x28] sm:$0xff]  ;;  %s711_s4 = sshll.u32 %s1069_s20, 4 }
   0xd   : > { %771 = vmatprep.subr.mxu1 %v277_v1  ;;  %750 = vmatpush3.msra.mxu0 %v687_v0  ;;  %v895_v7 = vshrl.u32 %v183_v3, 7  ;;  %v684_v8 = vld [vmem:[%s1057_s1 + $0x60] sm:$0xff]  ;;  %v683_v10 = vld [vmem:[%s1057_s1 + $0x58] sm:$0xff]  ;;  %s915_s11 = scalar_lea.vmem %s1056_s0, %s711_s4  ;;  %v682_v15 = vld [vmem:[%s1057_s1 + $0x50] sm:$0xff]  ;;  %s177_s22 = scalar_lea.vmem %s1059_s3, %s711_s4 }
   0xe   : > { %772 = vmatpush3.msra.mxu1 %v277_v1  ;;  %751 = vmatprep.subr.mxu0 %v686_v2  ;;  %v274_v9 = vld [vmem:[%s1057_s1 + $0x20] sm:$0xff]  ;;  %v273_v11 = vld [vmem:[%s1057_s1 + $0x18] sm:$0xff]  ;;  %v272_v16 = vld [vmem:[%s1057_s1 + $0x10] sm:$0xff] }
   0xf   : > { %773 = vmatprep.subr.mxu1 %v276_v4  ;;  %752 = vmatpush3.msra.mxu0 %v686_v2  ;;  %v918_v12 = vld [vmem:[%s915_s11] sm:$0xff]  ;;  %v921_v13 = vld [vmem:[%s915_s11 + $0x18] sm:$0xff]  ;;  %v192_v14 = vand.u32 15, %v895_v7  ;;  %vm244_vm0 = vcmp.lt.s32.totalorder %v895_v7, 1  ;;  %v934_v19 = vld [vmem:[%s915_s11 + $0x8] sm:$0xff]  ;;  %v186_v28 = vadd.s32 16, %v895_v7 }
  0x10   : > { %774 = vmatpush3.msra.mxu1 %v276_v4  ;;  %753 = vmatprep.subr.mxu0 %v685_v5  ;;  %v240_v17 = vrot.slane %v918_v12, 7  ;;  %v243_v18 = vrot.slane %v921_v13, 7  ;;  %v681_v20 = vld [vmem:[%s1057_s1 + $0x48] sm:$0xff]  ;;  %v241_v24 = vrot.slane %v934_v19, 7  ;;  %v680_v25 = vld [vmem:[%s1057_s1 + $0x40] sm:$0xff]  ;;  %v963_v30 = vld [vmem:[%s915_s11 + $0x10] sm:$0xff] }
  0x11   : > { %775 = vmatprep.subr.mxu1 %v275_v6  ;;  %754 = vmatpush3.msra.mxu0 %v685_v5  ;;  %v271_v21 = vld [vmem:[%s1057_s1 + $0x8] sm:$0xff]  ;;  %vm942_vm1 = vcmp.eq.s32.totalorder %v192_v14, 0  ;;  %v270_v26 = vld [vmem:[%s1057_s1] sm:$0xff]  ;;  %v703_v31 = vld [vmem:[%s1057_s1 + $0xb8] sm:$0xff]  ;;  %v242_v33 = vrot.slane %v963_v30, 7  ;;  %v206_v34 = vand.u32 15, %v186_v28 }
  0x12   : > { %776 = vmatpush3.msra.mxu1 %v275_v6  ;;  %755 = vmatprep.subr.mxu0 %v684_v8  ;;  %v248_v23 = vsel %vm244_vm0, %v243_v18, %v240_v17  ;;  %v247_v29 = vsel %vm244_vm0, %v240_v17, %v241_v24  ;;  %v702_v32 = vld [vmem:[%s1057_s1 + $0xb0] sm:$0xff]  ;;  %v701_v35 = vld [vmem:[%s1057_s1 + $0xa8] sm:$0xff]  ;;  %v700_v36 = vld [vmem:[%s1057_s1 + $0xa0] sm:$0xff]  ;;  %v185_v39 = vadd.s32 8, %v895_v7  ;;  %v187_v41 = vadd.s32 24, %v895_v7 }
  0x13   : > { %777 = vmatprep.subr.mxu1 %v274_v9  ;;  %756 = vmatpush3.msra.mxu0 %v684_v8  ;;  %v249_v27 = vsel %vm942_vm1, 0.0, %v248_v23  ;;  %vm984_vm3 = vcmp.eq.s32.totalorder %v206_v34, 0  ;;  %v246_v38 = vsel %vm244_vm0, %v241_v24, %v242_v33  ;;  %v699_v40 = vld [vmem:[%s1057_s1 + $0x98] sm:$0xff]  ;;  %v257_v43 = vrot.slane %v918_v12, 1  ;;  %v698_v48 = vld [vmem:[%s1057_s1 + $0x90] sm:$0xff]  ;;  %v697_v51 = vld [vmem:[%s1057_s1 + $0x88] sm:$0xff] }
  0x14   : > { %778 = vmatpush3.msra.mxu1 %v274_v9  ;;  %757 = vmatprep.subr.mxu0 %v683_v10  ;;  %v251_v42 = vsel %vm984_vm3, 0.0, %v246_v38  ;;  %v245_v44 = vsel %vm244_vm0, %v242_v33, %v243_v18  ;;  %v199_v45 = vand.u32 15, %v185_v39  ;;  %v258_v46 = vrot.slane %v934_v19, 1  ;;  %v696_v52 = vld [vmem:[%s1057_s1 + $0x80] sm:$0xff] }
  0x15   : > { %779 = vmatprep.subr.mxu1 %v273_v11  ;;  %758 = vmatpush3.msra.mxu0 %v683_v10  ;;  %v259_v47 = vrot.slane %v963_v30, 1  ;;  %v260_v49 = vrot.slane %v921_v13, 1  ;;  %v213_v50 = vand.u32 15, %v187_v41  ;;  %vm261_vm4 = vcmp.lt.s32.totalorder %v895_v7, 7  ;;  %v708_v8 = vld [vmem:[%s1058_s2] ss:$0 sm:$0xff] }
  0x16   : > { %780 = vmatpush3.msra.mxu1 %v273_v11  ;;  %759 = vmatprep.subr.mxu0 %v682_v15  ;;  %vm1021_vm5 = vcmp.eq.s32.totalorder %v199_v45, 15  ;;  %v264_v57 = vsel %vm261_vm4, %v257_v43, %v258_v46 }
  0x17   : > { %781 = vmatprep.subr.mxu1 %v272_v16  ;;  %760 = vmatpush3.msra.mxu0 %v682_v15  ;;  %v263_v54 = vsel %vm261_vm4, %v258_v46, %v259_v47  ;;  %vm1027_vm6 = vcmp.eq.s32.totalorder %v213_v50, 15  ;;  %v265_v56 = vsel %vm261_vm4, %v260_v49, %v257_v43  ;;  %v262_v58 = vsel %vm261_vm4, %v259_v47, %v260_v49 }
  0x18   : > { %782 = vmatpush3.msra.mxu1 %v272_v16  ;;  %761 = vmatprep.subr.mxu0 %v681_v20  ;;  %v267_v59 = vsel %vm1021_vm5, 0.0, %v263_v54  ;;  %v269_v60 = vsel %vm1027_vm6, 0.0, %v265_v56 }
  0x19   : > { %783 = vmatprep.subr.mxu1 %v271_v21  ;;  %762 = vmatpush3.msra.mxu0 %v681_v20 }
  0x1a   : > { %784 = vmatpush3.msra.mxu1 %v271_v21  ;;  %763 = vmatprep.subr.mxu0 %v680_v25 }
  0x1b   : > { %785 = vmatprep.subr.mxu1 %v270_v26  ;;  %764 = vmatpush3.msra.mxu0 %v680_v25 }
  0x1c   : > { %765 = vmatprep.mubr.msk.f32.mxu0 %vm287_vm2, %v918_v12  ;;  %786 = vmatpush3.msra.mxu1 %v270_v26 }
  0x1d   : > { %787 = vmatprep.mubr.msk.f32.mxu1 %vm287_vm2, %v249_v27  ;;  %766 = vmatmul.mubr.msk.f32.vlgmr.msra.gmra.mxu0 %vm287_vm2, %v934_v19 }
  0x1e   : > { %788 = vmatmul.mubr.msk.f32.vlgmr.msra.gmra.mxu1 %vm287_vm2, %v247_v29  ;;  %793 = vmatprep.subr.mxu0 %v703_v31 }
  0x1f   : > { %815 = vmatprep.subr.mxu1 %v703_v31  ;;  %794 = vmatpush3.msra.mxu0 %v703_v31 }
  0x20   : > { %823 = vmatpush3.msra.mxu1 %v703_v31  ;;  %795 = vmatprep.subr.mxu0 %v702_v32 }
  0x21   : > { %816 = vmatprep.subr.mxu1 %v702_v32  ;;  %796 = vmatpush3.msra.mxu0 %v702_v32 }
  0x22   : > { %824 = vmatpush3.msra.mxu1 %v702_v32  ;;  %797 = vmatprep.subr.mxu0 %v701_v35 }
  0x23   : > { %817 = vmatprep.subr.mxu1 %v701_v35  ;;  %798 = vmatpush3.msra.mxu0 %v701_v35 }
  0x24   : > { %825 = vmatpush3.msra.mxu1 %v701_v35  ;;  %799 = vmatprep.subr.mxu0 %v700_v36 }
  0x25   : > { %818 = vmatprep.subr.mxu1 %v700_v36  ;;  %800 = vmatpush3.msra.mxu0 %v700_v36 }
  0x26   : > { %826 = vmatpush3.msra.mxu1 %v700_v36  ;;  %801 = vmatprep.subr.mxu0 %v699_v40 }
  0x27   : > { %819 = vmatprep.subr.mxu1 %v699_v40  ;;  %768 = vmatprep.mubr.msk.f32.mxu0 %vm287_vm2, %v963_v30 }
  0x28   : > { %790 = vmatprep.mubr.msk.f32.mxu1 %vm287_vm2, %v251_v42  ;;  %802 = vmatpush3.msra.mxu0 %v699_v40 }
  0x29   : > { %827 = vmatpush3.msra.mxu1 %v699_v40  ;;  %769 = vmatmul.mubr.msk.f32.gmra.mxu0 %vm287_vm2, %v921_v13 }
  0x2a   : > { %791 = vmatmul.mubr.msk.f32.gmra.mxu1 %vm287_vm2, %v245_v44  ;;  %803 = vmatprep.subr.mxu0 %v698_v48 }
  0x2b   : > { %820 = vmatprep.subr.mxu1 %v698_v48  ;;  %804 = vmatpush3.msra.mxu0 %v698_v48 }
  0x2c   : > { %828 = vmatpush3.msra.mxu1 %v698_v48  ;;  %805 = vmatprep.subr.mxu0 %v697_v51 }
  0x2d   : > { %821 = vmatprep.subr.mxu1 %v697_v51  ;;  %806 = vmatpush3.msra.mxu0 %v697_v51 }
  0x2e   : > { %829 = vmatpush3.msra.mxu1 %v697_v51  ;;  %807 = vmatprep.subr.mxu0 %v696_v52 }
  0x2f   : > { %822 = vmatprep.subr.mxu1 %v696_v52  ;;  %808 = vmatpush3.msra.mxu0 %v696_v52 }
  0x30   : > { %830 = vmatpush3.msra.mxu1 %v696_v52  ;;  %809 = vmatprep.mubr.msk.f32.mxu0 %vm287_vm2, %v264_v57 }
  0x31   : > { %812 = vmatprep.mubr.msk.f32.mxu1 %vm287_vm2, %v262_v58  ;;  %810 = vmatmul.mubr.msk.f32.vlgmr.msra.gmra.mxu0 %vm287_vm2, %v267_v59 }
  0x32   : > { %813 = vmatmul.mubr.msk.f32.vlgmr.msra.gmra.mxu1 %vm287_vm2, %v269_v60 }
  0xdd   : > { %v767_v61 = vpop.f32.mrf.mxu0 }
  0xde   : > { %v789_v62 = vpop.f32.mrf.mxu1 }
  0xdf   : > { %v366_v63 = vpop.f32.mrf.mxu0  ;;  %v469_v5 = vadd.f32 %v789_v62, %v767_v61 }
  0xe0   : > { %v463_v0 = vpop.f32.mrf.mxu1 }
  0xe1   : > { %v464_v10 = vadd.f32 %v463_v0, %v366_v63 }
  0xe9   : > { %v770_v1 = vpop.f32.mrf.mxu0 }
  0xea   : > { %v792_v2 = vpop.f32.mrf.mxu1 }
  0xeb   : > { %v376_v3 = vpop.f32.mrf.mxu0  ;;  %v479_v6 = vadd.f32 %v792_v2, %v770_v1 }
  0xec   : > { %v473_v4 = vpop.f32.mrf.mxu1 }
  0xed   : > { %v474_v11 = vadd.f32 %v473_v4, %v376_v3 }
  0xf1   : > { %v811_v7 = vpop.f32.mrf.mxu0 }
  0xf2   : > { %v814_v9 = vpop.f32.mrf.mxu1  ;;  %v589_v12 = vadd.f32 %v811_v7, %v469_v5 }
  0xf3   : > { %v591_v13 = vadd.f32 %v814_v9, %v479_v6  ;;  %v569_v14 = vpop.f32.mrf.mxu0 }
  0xf4   : > { %v579_v15 = vpop.f32.mrf.mxu1  ;;  %v600_v16 = vadd.f32 %v708_v8, %v589_v12  ;;  %v588_v18 = vadd.f32 %v569_v14, %v464_v10 }
  0xf5   : > { %v602_v17 = vadd.f32 %v708_v8, %v591_v13  ;;  %v590_v19 = vadd.f32 %v579_v15, %v474_v11 }
  0xf6   : > { %v604_v20 = vmax.f32 %v600_v16, 0.0  ;;  %v599_v22 = vadd.f32 %v708_v8, %v588_v18 }
  0xf7   : > { %v606_v21 = vmax.f32 %v602_v17, 0.0  ;;  %v601_v23 = vadd.f32 %v708_v8, %v590_v19 }
  0xf8   : > { %608 = vst [vmem:[%s177_s22 + $0x8] sm:$0xff] %v604_v20  ;;  %v603_v24 = vmax.f32 %v599_v22, 0.0 }
  0xf9   : > { %v605_v25 = vmax.f32 %v601_v23, 0.0  ;;  %610 = vst [vmem:[%s177_s22 + $0x18] sm:$0xff] %v606_v21 }
  0xfa   : > { %607 = vst [vmem:[%s177_s22] sm:$0xff] %v603_v24 }
  0xfb   : > { %609 = vst [vmem:[%s177_s22 + $0x10] sm:$0xff] %v605_v25 }
  0xfc PF: > { %s13_s12 = sadd.s32 1, %s845_s12  }
  0xfd   : > { %p10_p4 = scmp.ge.s32.totalorder %s13_s12, 4  }
  0xff   :  { %12 = sbr.rel (!%p10_p4) target bundleno = 1 (0x1), region = 64 }

</bundles_post_ra>
